<compile_context>
chip_gen: v6e
topology: v6e:2x2x1
jax: 0.10.0
libtpu: 0.0.40
codegen_flags: <defaults>
</compile_context>

<pallas_src>
import functools

import jax
import jax.numpy as jnp
from jax.experimental import pallas as pl
from jax.experimental.pallas import tpu as pltpu

VMEM = pltpu.MemorySpace.VMEM

LSTM_SUBLANE_BATCH = 8   # clauses per grid step -> h/c/gates fill whole 8x128 vregs


# ----------------------------------------------------------------------------
# Fused multi-layer MLP kernel:  x -> act_1(x W1 + b1) -> ... -> act_L(...)
# Weights are pre-transposed to (K, N); biases are (1, N).  Whole-array VMEM
# residency: total weights are far below the scoped VMEM limit on v5e/v6e/v7x.
# ----------------------------------------------------------------------------
def _mlp_kernel(*refs, num_layers, acts):
    x_ref, o_ref = refs[0], refs[-1]
    x = x_ref[...].astype(jnp.float32)
    for l in range(num_layers):                       # static, small
        wt = refs[1 + 2 * l][...]                     # (K_l, N_l)
        b = refs[2 + 2 * l][...]                      # (1, N_l)
        x = jnp.dot(x, wt, preferred_element_type=jnp.float32) + b
        if acts[l] == "relu":
            x = jnp.maximum(x, 0.0)
    o_ref[...] = x.astype(o_ref.dtype)


@functools.lru_cache(maxsize=None)
def _build_mlp_call(m, layer_shapes, acts):
    num_layers = len(layer_shapes)
    out_n = layer_shapes[-1][1]
    fn = pl.pallas_call(
        functools.partial(_mlp_kernel, num_layers=num_layers, acts=acts),
        out_shape=jax.ShapeDtypeStruct((m, out_n), jnp.float32),
        in_specs=[pl.BlockSpec(memory_space=VMEM)] * (1 + 2 * num_layers),
        out_specs=pl.BlockSpec(memory_space=VMEM),
    )
    return jax.jit(fn)


def pallas_mlp(x, layers, acts):
    """x: (M, K) f32.  layers: [(wt (K_l, N_l), b (1, N_l)), ...] pre-packed."""
    layer_shapes = tuple(wt.shape for wt, _ in layers)
    fn = _build_mlp_call(int(x.shape[0]), layer_shapes, tuple(acts))
    flat = []
    for wt, b in layers:
        flat.append(wt)
        flat.append(b)
    return fn(x, *flat)


# ----------------------------------------------------------------------------
# Batched multi-layer LSTM.  Grid over blocks of LSTM_SUBLANE_BATCH clauses;
# packed gate weights are VMEM-resident for all grid steps (constant index_map).
#   len_ref : (blk, 1)   int32   per-clause sequence lengths (0 for padding rows)
#   x_ref   : (blk, T, H)        padded input sequences
#   wih_ref : (L, H, 4H)         PyTorch W_ih^T, gates packed (i,f,g,o) on lanes
#   whh_ref : (L, H, 4H)
#   b_ref   : (L, 1, 4H)         (= b_ih + b_hh)
#   o_ref   : (blk, H)           h of the last layer at each clause's last real step
#   seq_ref : (T, blk, H) VMEM scratch carrying the sequence between layers
# ----------------------------------------------------------------------------
def _lstm_batched_kernel(len_ref, x_ref, wih_ref, whh_ref, b_ref, o_ref, seq_ref,
                         *, num_layers, hidden, t_max, blk):
    lens = len_ref[...]                               # (blk, 1) int32
    x = x_ref[...].astype(jnp.float32)                # (blk, T, H)
    h = jnp.zeros((blk, hidden), jnp.float32)

    for layer in range(num_layers):                   # static, small
        wih = wih_ref[layer]                          # (H, 4H)
        whh = whh_ref[layer]                          # (H, 4H)
        b = b_ref[layer]                              # (1, 4H)

        h = jnp.zeros((blk, hidden), jnp.float32)
        c = jnp.zeros((blk, hidden), jnp.float32)
        # Static unroll: T is small & static for this workload.
        # TODO(synk): switch to lax.fori_loop for long clauses to bound code size.
        for t in range(t_max):
            xt = x[:, t, :] if layer == 0 else seq_ref[t]          # (blk, H)
            gates = (jnp.dot(xt, wih, preferred_element_type=jnp.float32)
                     + jnp.dot(h, whh, preferred_element_type=jnp.float32)
                     + b)                                          # (blk, 4H)
            # Slab-wise activations: one full-width sigmoid + one tanh on the g slab.
            sig = jax.nn.sigmoid(gates)
            g_g = jnp.tanh(gates[:, 2 * hidden:3 * hidden])
            i_g = sig[:, 0 * hidden:1 * hidden]
            f_g = sig[:, 1 * hidden:2 * hidden]
            o_g = sig[:, 3 * hidden:4 * hidden]
            c_new = f_g * c + i_g * g_g
            h_new = o_g * jnp.tanh(c_new)
            # Freeze state once past each clause's real length -> h at T_max equals
            # h at length-1, i.e. torch's output[-1][0] for the unpadded sequence.
            live = lens > t                                        # (blk, 1)
            c = jnp.where(live, c_new, c)
            h = jnp.where(live, h_new, h)
            if layer < num_layers - 1:
                seq_ref[t] = h                         # feed next layer via scratch

    o_ref[...] = h.astype(o_ref.dtype)


@functools.lru_cache(maxsize=None)
def _build_lstm_batched_call(n_pad, t_max, hidden, num_layers, blk):
    grid = (n_pad // blk,)
    fn = pl.pallas_call(
        functools.partial(_lstm_batched_kernel, num_layers=num_layers,
                          hidden=hidden, t_max=t_max, blk=blk),
        out_shape=jax.ShapeDtypeStruct((n_pad, hidden), jnp.float32),
        grid_spec=pltpu.PrefetchScalarGridSpec(
            num_scalar_prefetch=0,
            grid=grid,
            in_specs=[
                pl.BlockSpec((blk, 1), lambda i: (i, 0)),                 # lengths
                pl.BlockSpec((blk, t_max, hidden), lambda i: (i, 0, 0)),  # sequences
                # constant block index -> weights stay VMEM-resident across the grid
                pl.BlockSpec((num_layers, hidden, 4 * hidden), lambda i: (0, 0, 0)),
                pl.BlockSpec((num_layers, hidden, 4 * hidden), lambda i: (0, 0, 0)),
                pl.BlockSpec((num_layers, 1, 4 * hidden), lambda i: (0, 0, 0)),
            ],
            out_specs=pl.BlockSpec((blk, hidden), lambda i: (i, 0)),
            scratch_shapes=[pltpu.VMEM((t_max, blk, hidden), jnp.float32)],
        ),
        compiler_params=pltpu.CompilerParams(
            dimension_semantics=("parallel",)),       # 2 TensorCores on v7x
    )
    return jax.jit(fn)


def pallas_lstm_batched(seqs, packed):
    """seqs: list of (T_i, H) f32 arrays.  packed = (wih, whh, b) from
    _init_lstm_packed.  Returns (len(seqs), H): last-layer h at each seq's end."""
    wih_packed, whh_packed, b_packed = packed
    num_layers = int(whh_packed.shape[0])
    hidden = int(whh_packed.shape[1])
    blk = LSTM_SUBLANE_BATCH
    n = len(seqs)
    t_max = max(int(s.shape[0]) for s in seqs)
    n_pad = ((n + blk - 1) // blk) * blk

    rows, lens = [], []
    for s in seqs:
        t = int(s.shape[0])
        lens.append(t)
        if t < t_max:
            s = jnp.concatenate(
                [s, jnp.zeros((t_max - t, hidden), jnp.float32)], axis=0)
        rows.append(s.astype(jnp.float32))
    if n_pad > n:
        pad = jnp.zeros((t_max, hidden), jnp.float32)
        rows.extend([pad] * (n_pad - n))
        lens.extend([0] * (n_pad - n))
    x = jnp.stack(rows, axis=0)                                   # (n_pad, T, H)
    lens_arr = jnp.asarray(lens, jnp.int32).reshape(n_pad, 1)

    fn = _build_lstm_batched_call(n_pad, t_max, hidden, num_layers, blk)
    out = fn(lens_arr, x, wih_packed, whh_packed, b_packed)       # (n_pad, H)
    return out[:n]


# ----------------------------------------------------------------------------
# Deterministic parameter initialization (PyTorch-like), pre-packed for kernels.
# TODO(synk): store packed weights as bf16 on v6e/v7x (f32 accumulation) once a
# numerics tolerance vs the f32 reference is agreed; kept f32 here for parity.
# ----------------------------------------------------------------------------
def _init_linear_packed(key, out_f, in_f):
    k1, k2 = jax.random.split(key)
    bound = 1.0 / (in_f ** 0.5)
    w = jax.random.uniform(k1, (out_f, in_f), jnp.float32, -bound, bound)
    b = jax.random.uniform(k2, (out_f,), jnp.float32, -bound, bound)
    return jnp.swapaxes(w, 0, 1), b.reshape(1, out_f)       # (in, out), (1, out)


def _init_mlp_packed(key, sizes):
    layers = []
    for (in_f, out_f) in sizes:
        key, sub = jax.random.split(key)
        layers.append(_init_linear_packed(sub, out_f, in_f))
    return layers


def _init_lstm_packed(key, num_layers, hidden):
    """Gate order (i,f,g,o) like torch.nn.LSTM; packed to (L, H, 4H) / (L, 1, 4H)."""
    # NOTE: assumes input_size == hidden_size for every layer (true here since
    # conjecture_dim == dim).  TODO(synk): generalize layer-0 input width if
    # conjecture_dim ever differs from dim.
    bound = 1.0 / (hidden ** 0.5)
    wih, whh, bb = [], [], []
    for _ in range(num_layers):
        key, k1, k2, k3, k4 = jax.random.split(key, 5)
        wih.append(jax.random.uniform(k1, (4, hidden, hidden), jnp.float32, -bound, bound))
        whh.append(jax.random.uniform(k2, (4, hidden, hidden), jnp.float32, -bound, bound))
        b_ih = jax.random.uniform(k3, (4, hidden), jnp.float32, -bound, bound)
        b_hh = jax.random.uniform(k4, (4, hidden), jnp.float32, -bound, bound)
        bb.append(b_ih + b_hh)
    wih = jnp.stack(wih)                                      # (L, 4, H_out, H_in)
    whh = jnp.stack(whh)
    bb = jnp.stack(bb)                                        # (L, 4, H)
    # packed[l, i_in, g*H + o_out] = W[l, g, o_out, i_in]  ==  W_gate^T columns
    wih_packed = jnp.transpose(wih, (0, 3, 1, 2)).reshape(num_layers, hidden, 4 * hidden)
    whh_packed = jnp.transpose(whh, (0, 3, 1, 2)).reshape(num_layers, hidden, 4 * hidden)
    b_packed = bb.reshape(num_layers, 1, 4 * hidden)
    return wih_packed, whh_packed, b_packed


# ----------------------------------------------------------------------------
# RNNennigma forward in JAX.  Recursion / caching is Python glue; all matmul /
# LSTM / MLP hot paths run in the fused & batched Pallas kernels above.
# ----------------------------------------------------------------------------
class RNNennigmaPallas:
    def __init__(self, model_params, key):
        self.dim = model_params["dimension"]
        self.str_to_int = model_params["str_to_int"]
        self.int_to_str = model_params["int_to_str"]
        self.arity = model_params["arity"]
        self.symbol_to_type = model_params["symbol_to_type"]
        self.pred_depth = model_params["pred_depth"]
        self.fnc_depth = model_params["fnc_depth"]
        self.clause_depth = model_params["clause_depth"]
        self.conjecture_depth = model_params["conjecture_depth"]
        self.use_conjecture = True
        self.conjecture_dim = self.dim            # default: conjecture_dim == dim
        self.fileid_to_conj = model_params["fileid_to_conj"]
        # comb_type == 'LinearReLU', final_type == 'LinearReLU',
        # random_order = False, cache = True, uncommon_trans = {} (identity).

        key, k_emb = jax.random.split(key)
        self.s_emb = jax.random.normal(k_emb, (len(self.str_to_int), self.dim),
                                       jnp.float32) * 0.1

        # per-symbol combiner MLPs:  (depth-1) x [Linear(d*a, d*a), ReLU]
        #                            + [Linear(d*a, d), ReLU]
        self.symbol = {}
        self.symbol_acts = {}
        for s, ar in sorted(self.arity.items()):
            s_type = self.symbol_to_type[s]
            if s_type in ("FUNCTION", "SKOLEM_FUNCTION"):
                depth = self.fnc_depth
            else:                                  # predicates and '='
                depth = self.pred_depth
            sizes = [(self.dim * ar, self.dim * ar)] * (depth - 1) \
                    + [(self.dim * ar, self.dim)]
            key, ks = jax.random.split(key)
            self.symbol[s] = _init_mlp_packed(ks, sizes)
            self.symbol_acts[s] = ("relu",) * depth

        # final: Linear(conj_dim + dim, max(2, dim//2)), ReLU, Linear(., 2)
        hid = max(2, self.dim // 2)
        key, kf = jax.random.split(key)
        self.final = _init_mlp_packed(kf, [(self.conjecture_dim + self.dim, hid),
                                           (hid, 2)])
        self.final_acts = ("relu", "none")
        # TODO(synk): fusing the final MLP into the clause-LSTM epilogue is blocked
        # by the conjecture-vector dependency (it is itself an LSTM output).

        # clause / conjecture LSTMs (packed gate layout)
        key, k1, k2 = jax.random.split(key, 3)
        self.clause_lstm = _init_lstm_packed(k1, self.clause_depth, self.dim)
        self.conjecture_lstm = _init_lstm_packed(k2, self.conjecture_depth,
                                                 self.conjecture_dim)

        self.cache_repr = {}
        self.cache_conjecture = {}

    # ---- term embeddings: level/symbol-batched combiner MLPs -----------------
    def _compute_terms(self, roots):
        """Fill cache_repr for every (sub)term reachable from `roots`, running one
        fused pallas_mlp per (tree level, symbol) group instead of one per term."""
        level_of = {}

        def visit(term):
            if term in level_of:
                return level_of[term]
            if term in self.cache_repr:
                level_of[term] = -1
                return -1
            if not isinstance(term, tuple):
                self.cache_repr[term] = self.s_emb[term][None, :]   # (1, dim)
                level_of[term] = -1
                return -1
            lv = 0
            for t in term[1:]:
                lv = max(lv, visit(t) + 1)
            level_of[term] = lv
            return lv

        for r in roots:
            visit(r)

        max_lv = max(level_of.values(), default=-1)
        if max_lv < 0:
            return
        levels = [{} for _ in range(max_lv + 1)]
        for term, lv in level_of.items():
            if lv >= 0:
                levels[lv].setdefault(term[0], []).append(term)

        for groups in levels:                          # bottom-up
            for sym in sorted(groups):
                terms = groups[sym]
                xs = jnp.concatenate(
                    [jnp.concatenate([self.cache_repr[t] for t in term[1:]], axis=-1)
                     for term in terms], axis=0)       # (M, dim * arity)
                out = pallas_mlp(xs, self.symbol[sym], self.symbol_acts[sym])  # (M, dim)
                for i, term in enumerate(terms):
                    self.cache_repr[term] = out[i:i + 1]

    # recursive term embedding (self.compute in the PyTorch module)
    def compute(self, term):
        self._compute_terms([term])
        return self.cache_repr[term]

    # ---- clause / conjecture LSTM encoders ------------------------------------
    def _clause_vectors(self, clause_list):
        """Batched clause-LSTM over clause_list (literal reprs must be cached)."""
        seqs = [jnp.concatenate([self.cache_repr[l] for l in clause], axis=0)
                for clause in clause_list]                       # list of (L_i, dim)
        return pallas_lstm_batched(seqs, self.clause_lstm)       # (n, dim)

    def compute_clause(self, clause):
        self._compute_terms(list(clause))
        return self._clause_vectors([clause])                    # (1, dim)

    def compute_conjecture(self, fileid):
        if fileid not in self.cache_conjecture:
            conj = self.fileid_to_conj[fileid]
            self._compute_terms([lit for c in conj for lit in c])
            cvecs = self._clause_vectors(conj)                   # (n_conj, dim)
            out = pallas_lstm_batched([cvecs], self.conjecture_lstm)
            self.cache_conjecture[fileid] = out                  # (1, conj_dim)
        return self.cache_conjecture[fileid]

    def compute_final(self, clause):
        clause_in, fileid = clause
        x = jnp.concatenate([self.compute_clause(clause_in),
                             self.compute_conjecture(fileid)], axis=-1)
        return pallas_mlp(x, self.final, self.final_acts)        # (1, 2)

    # ---- batched forward -------------------------------------------------------
    def forward(self, clauses):
        # TODO(synk): the whole forward cannot be a single jax.jit trace because the
        # recursion schedule / batching groups are data-dependent Python; each Pallas
        # callable is individually jitted and shape-cached instead.
        target = [c for (c, _) in clauses]
        new_fileids = []
        for (_, f) in clauses:
            if f not in self.cache_conjecture and f not in new_fileids:
                new_fileids.append(f)

        # gather every clause that needs the clause-LSTM (targets + new conjectures)
        all_clauses = list(target)
        spans = {}
        for f in new_fileids:
            conj = self.fileid_to_conj[f]
            spans[f] = (len(all_clauses), len(all_clauses) + len(conj))
            all_clauses.extend(conj)

        # 1) level/symbol-batched combiner MLPs over every literal of every clause
        self._compute_terms([lit for c in all_clauses for lit in c])

        # 2) ONE batched clause-LSTM launch (weights VMEM-resident across the grid)
        cvecs = self._clause_vectors(all_clauses)                # (n_all, dim)

        # 3) batched conjecture-LSTM over all uncached fileids
        if new_fileids:
            seqs = [cvecs[spans[f][0]:spans[f][1]] for f in new_fileids]
            pvecs = pallas_lstm_batched(seqs, self.conjecture_lstm)  # (n_files, cdim)
            for i, f in enumerate(new_fileids):
                self.cache_conjecture[f] = pvecs[i:i + 1]

        # 4) single fused final MLP batched over all clauses
        feats = [jnp.concatenate([cvecs[i:i + 1], self.cache_conjecture[f]], axis=-1)
                 for i, (_, f) in enumerate(clauses)]
        x = jnp.concatenate(feats, axis=0)                       # (n, dim + conj_dim)
        out = pallas_mlp(x, self.final, self.final_acts)         # (n, 2)
        return out.reshape(-1)                                   # (2 * n_clauses,)

    def clear_caches(self):
        self.cache_repr = {}
        self.cache_conjecture = {}


# ----------------------------------------------------------------------------
if __name__ == "__main__":
    key = jax.random.PRNGKey(0)

    str_to_int = {"=": 0, "p": 1, "f": 2, "g": 3, "a": 4, "b": 5, "X0": 6, "c": 7}
    int_to_str = {v: k for k, v in str_to_int.items()}
    arity = {0: 2, 1: 2, 2: 2, 3: 1}          # '=', 'p', 'f' binary; 'g' unary
    symbol_to_type = {0: "PREDICATE", 1: "PREDICATE", 2: "FUNCTION", 3: "FUNCTION"}

    EQ, P, F, G, A, B, X, C = range(8)
    # conjecture clauses for fileid 0
    fileid_to_conj = {0: [[(EQ, (G, A), B)],
                          [(P, A, (F, B, X))]]}

    model_params = dict(
        dimension=32, pred_depth=2, fnc_depth=2,
        clause_depth=2, conjecture_depth=2,
        str_to_int=str_to_int, int_to_str=int_to_str,
        arity=arity, symbol_to_type=symbol_to_type,
        fileid_to_conj=fileid_to_conj,
    )
    # TODO(synk): random_order / uncommon_trans symbol remapping are data-side
    # preprocessing with no tensor compute; kept as identity / disabled here.

    model = RNNennigmaPallas(model_params, key)

    lit1 = (P, (F, A, X), B)          # p(f(a, X0), b)
    lit2 = (EQ, (G, A), C)            # g(a) = c
    lit3 = (P, C, (G, (F, A, B)))     # p(c, g(f(a, b)))
    clause1 = [lit1, lit2]
    clause2 = [lit3]
    clauses = [(clause1, 0), (clause2, 0)]

    out = model.forward(clauses)
    out = jax.block_until_ready(out)
    assert out.shape == (len(clauses) * 2,), out.shape
    assert bool(jnp.all(jnp.isfinite(out)))
    print("KERNEL_OK")
</pallas_src>

<mosaic_0001>
module attributes {stable_mosaic.version = 11 : i64} {
  func.func @_mlp_kernel(%arg0: memref<3x64xf32, #tpu.memory_space<vmem>>, %arg1: memref<64x64xf32, #tpu.memory_space<vmem>>, %arg2: memref<1x64xf32, #tpu.memory_space<vmem>>, %arg3: memref<64x32xf32, #tpu.memory_space<vmem>>, %arg4: memref<1x32xf32, #tpu.memory_space<vmem>>, %arg5: memref<3x32xf32, #tpu.memory_space<vmem>>) attributes {dimension_semantics = [], scalar_prefetch = 0 : i64, scratch_operands = 0 : i64, tpu.core_type = #tpu.core_type<tc>} {
    %c0 = arith.constant 0 : index
    %c0_0 = arith.constant 0 : index
    %0 = vector.load %arg0[%c0, %c0_0] : memref<3x64xf32, #tpu.memory_space<vmem>>, vector<3x64xf32>
    %c0_1 = arith.constant 0 : index
    %c0_2 = arith.constant 0 : index
    %1 = vector.load %arg1[%c0_1, %c0_2] : memref<64x64xf32, #tpu.memory_space<vmem>>, vector<64x64xf32>
    %c0_3 = arith.constant 0 : index
    %c0_4 = arith.constant 0 : index
    %2 = vector.load %arg2[%c0_3, %c0_4] : memref<1x64xf32, #tpu.memory_space<vmem>>, vector<1x64xf32>
    %cst = arith.constant dense<0.000000e+00> : vector<3x64xf32>
    %3 = tpu.matmul %0, %1, %cst {dimension_numbers = #tpu.dot_dimension_numbers<[1], [0], [0], [1], [0, 0, 1, 1], [], []>} : vector<3x64xf32>, vector<64x64xf32>, vector<3x64xf32> -> vector<3x64xf32>
    %4 = vector.broadcast %2 : vector<1x64xf32> to vector<3x64xf32>
    %5 = arith.addf %3, %4 : vector<3x64xf32>
    %cst_5 = arith.constant 0.000000e+00 : f32
    %6 = vector.broadcast %cst_5 : f32 to vector<3x64xf32>
    %7 = arith.maximumf %5, %6 : vector<3x64xf32>
    %c0_6 = arith.constant 0 : index
    %c0_7 = arith.constant 0 : index
    %8 = vector.load %arg3[%c0_6, %c0_7] : memref<64x32xf32, #tpu.memory_space<vmem>>, vector<64x32xf32>
    %c0_8 = arith.constant 0 : index
    %c0_9 = arith.constant 0 : index
    %9 = vector.load %arg4[%c0_8, %c0_9] : memref<1x32xf32, #tpu.memory_space<vmem>>, vector<1x32xf32>
    %cst_10 = arith.constant dense<0.000000e+00> : vector<3x32xf32>
    %10 = tpu.matmul %7, %8, %cst_10 {dimension_numbers = #tpu.dot_dimension_numbers<[1], [0], [0], [1], [0, 0, 1, 1], [], []>} : vector<3x64xf32>, vector<64x32xf32>, vector<3x32xf32> -> vector<3x32xf32>
    %11 = vector.broadcast %9 : vector<1x32xf32> to vector<3x32xf32>
    %12 = arith.addf %10, %11 : vector<3x32xf32>
    %cst_11 = arith.constant 0.000000e+00 : f32
    %13 = vector.broadcast %cst_11 : f32 to vector<3x32xf32>
    %14 = arith.maximumf %12, %13 : vector<3x32xf32>
    %c0_12 = arith.constant 0 : index
    %c0_13 = arith.constant 0 : index
    %15 = vector.load %arg5[%c0_12, %c0_13] : memref<3x32xf32, #tpu.memory_space<vmem>>, vector<3x32xf32>
    tpu.vector_store %arg5[%c0_12, %c0_13], %14 {strides = array<i32>} : memref<3x32xf32, #tpu.memory_space<vmem>>, vector<3x32xf32>,
    return
  }
}

</mosaic_0001>

<bundles_post_ra>
// kernel: tpu_custom_call.1
= control target key start
LH: loop header
LB: loop body
LE: loop exit
PB: predicated region body
PF: predicated region fallthrough
CT: control target
= control target key end

     0   :  { %v302_v1 = vmov 0.0   ;;  %vm303_vm0 = vmmov 0   ;;  %s397_s0 = inlined_call_operand.vmem [shape: f32[3,64], index: 0, kind: input, shape index: {}]   ;;  %s398_s1 = inlined_call_operand.vmem [shape: f32[64,64], index: 1, kind: input, shape index: {}]   ;;  %s399_s2 = inlined_call_operand.vmem [shape: f32[1,64], index: 2, kind: input, shape index: {}]   ;;  %s400_s3 = inlined_call_operand.vmem [shape: f32[64,32], index: 3, kind: input, shape index: {}]   ;;  %s401_s4 = inlined_call_operand.vmem [shape: f32[1,32], index: 4, kind: input, shape index: {}]   ;;  %s402_s5 = inlined_call_operand.hbm [shape: f32[3,32], index: 5, kind: output, shape index: {}]  }
   0x1   :  { %v29_v0 = vld [vmem:[%s398_s1 + $0x38] sm:$0xff]  ;;  %239 = vmatprep.subr.mxu0 %v302_v1  ;;  %v28_v2 = vld [vmem:[%s398_s1 + $0x30] sm:$0xff]  ;;  %255 = vmatprep.mubr.msk.f32.mxu0 %vm303_vm0, %v302_v1  ;;  %v27_v3 = vld [vmem:[%s398_s1 + $0x28] sm:$0xff] }
   0x2   :  { %240 = vmatpush3.msra.mxu0 %v29_v0  ;;  %258 = vmatprep.subr.mxu1 %v302_v1  ;;  %v119_v4 = vld [vmem:[%s400_s3 + $0x38] sm:$0xff]  ;;  %v118_v5 = vld [vmem:[%s400_s3 + $0x30] sm:$0xff]  ;;  %v26_v6 = vld [vmem:[%s398_s1 + $0x20] sm:$0xff] }
   0x3   :  { %241 = vmatprep.subr.mxu0 %v302_v1  ;;  %274 = vmatprep.mubr.msk.f32.mxu1 %vm303_vm0, %v302_v1  ;;  %v117_v7 = vld [vmem:[%s400_s3 + $0x28] sm:$0xff] }
   0x4   :  { %242 = vmatpush3.msra.mxu0 %v28_v2  ;;  %259 = vmatpush3.msra.mxu1 %v119_v4 }
   0x5   :  { %243 = vmatprep.subr.mxu0 %v302_v1  ;;  %260 = vmatprep.subr.mxu1 %v302_v1 }
   0x6   :  { %10 = vsyncpa [#allocation3], 0  ;;  %244 = vmatpush3.msra.mxu0 %v27_v3  ;;  %261 = vmatpush3.msra.mxu1 %v118_v5  ;;  %v25_v8 = vld [vmem:[%s398_s1 + $0x18] sm:$0xff]  ;;  %v116_v9 = vld [vmem:[%s400_s3 + $0x20] sm:$0xff]  ;;  %vm37_vm1 = vcmask 523264   ;;  %s304_s29 = smov [#allocation2]  }
   0x7   :  { %245 = vmatprep.subr.mxu0 %v302_v1  ;;  %262 = vmatprep.subr.mxu1 %v302_v1  ;;  %v24_v10 = vld [vmem:[%s398_s1 + $0x10] sm:$0xff]  ;;  %v115_v11 = vld [vmem:[%s400_s3 + $0x18] sm:$0xff]  ;;  %v23_v12 = vld [vmem:[%s398_s1 + $0x8] sm:$0xff]  ;;  %s209_s30 = sshll.u32 %s304_s29, 4  ;;  %vm201_vm2 = vcmask 256000   ;;  %s210_s30 = int_to_ptr.vmem [resolvable:$true] %s209_s30 }
   0x8   :  { %246 = vmatpush3.msra.mxu0 %v26_v6  ;;  %263 = vmatpush3.msra.mxu1 %v117_v7  ;;  %v22_v13 = vld [vmem:[%s398_s1] sm:$0xff]  ;;  %v114_v15 = vld [vmem:[%s400_s3 + $0x10] sm:$0xff]  ;;  %v113_v16 = vld [vmem:[%s400_s3 + $0x8] sm:$0xff]  ;;  %p285_p1 = scmp.lt.s32.totalorder %s210_s30, %s210_s30 }
   0x9   :  { %247 = vmatprep.subr.mxu0 %v302_v1  ;;  %264 = vmatprep.subr.mxu1 %v302_v1  ;;  %v21_v14 = vld [vmem:[%s397_s0] sm:$0x7] }
   0xa   :  { %248 = vmatpush3.msra.mxu0 %v25_v8  ;;  %265 = vmatpush3.msra.mxu1 %v116_v9  ;;  %v112_v17 = vld [vmem:[%s400_s3] sm:$0xff] }
   0xb   :  { %249 = vmatprep.subr.mxu0 %v302_v1  ;;  %266 = vmatprep.subr.mxu1 %v302_v1  ;;  %v217_v18 = vld [vmem:[%s399_s2] ss:$0 sm:$0xff]  ;;  %s280_s2 = scalar_lea.vmem %s210_s30, 64 }
   0xc   :  { %250 = vmatpush3.msra.mxu0 %v24_v10  ;;  %267 = vmatpush3.msra.mxu1 %v115_v11  ;;  %v219_v23 = vld [vmem:[%s401_s4] ss:$0 sm:$0xff]  ;;  %p281_p0 = scmp.ne.s32.totalorder %s210_s30, %s280_s2  ;;  %p286_p2 = scmp.lt.s32.totalorder %s280_s2, %s280_s2 }
   0xd   :  { %251 = vmatprep.subr.mxu0 %v302_v1  ;;  %268 = vmatprep.subr.mxu1 %v302_v1 }
   0xe   :  { %252 = vmatpush3.msra.mxu0 %v23_v12  ;;  %269 = vmatpush3.msra.mxu1 %v114_v15  ;;  %p287_p3 = por %p286_p2, %p285_p1 }
   0xf   :  { %253 = vmatprep.subr.mxu0 %v302_v1  ;;  %270 = vmatprep.subr.mxu1 %v302_v1 }
  0x10   :  { %254 = vmatpush3.msra.mxu0 %v22_v13  ;;  %271 = vmatpush3.msra.mxu1 %v113_v16  ;;  %p288_p4 = pnand %p287_p3, %p281_p0 }
  0x11   :  { %256 = vmatmul.mubr.msk.f32.vlgmr.msra.gmra.mxu0 %vm37_vm1, %v21_v14  ;;  %272 = vmatprep.subr.mxu1 %v302_v1 }
  0x12   :  { %273 = vmatpush3.msra.mxu1 %v112_v17 }
  0xd1   :  { %v107_v19 = vpop.f32.mrf.mxu0 }
  0xd2   :  { %v108_v20 = vadd.f32 %v217_v18, %v107_v19 }
  0xd3   :  { %v257_v21 = vpop.f32.mrf.mxu0 }
  0xd4   :  { %v111_v22 = vmax.f32 %v108_v20, 0.0 }
  0xd6   :  { %275 = vmatmul.mubr.msk.f32.vlgmr.msra.gmra.mxu1 %vm37_vm1, %v111_v22 }
 0x196   :  { %v196_v24 = vpop.f32.mrf.mxu1 }
 0x197   :  { %v197_v25 = vadd.f32 %v219_v23, %v196_v24 }
 0x198   :  { %v276_v26 = vpop.f32.mrf.mxu1 }
 0x199   :  { %v200_v27 = vmax.f32 %v197_v25, 0.0 }
 0x19b   :  { %202 = vst.msk [vmem:[#allocation2] sm:$0x7] %vm201_vm2, %v200_v27 }
 0x19c   :  { %291 = shalt.err (!%p288_p4)
}
 0x19d   :  { %212 = dma.vmem_to_hbm [thread:$0]  %s210_s30, 64, %s402_s5, [#allocation3]  }
 0x19e   :  { %300 = dma.done.wait [#allocation3], 64  }
 0x19f   :  { %301 = vsyncadd [#allocation3], 4294967232 }
 0x1a0   :  { %216 = vsyncpa [#allocation3], 1 }

</bundles_post_ra>
